<compile_context>
chip_gen: v7x
topology: tpu7x:2x2x1
jax: 0.10.0
libtpu: 0.0.40
codegen_flags: <defaults>
</compile_context>

<pallas_src>
import functools

import jax
import jax.numpy as jnp
from jax.experimental import pallas as pl
from jax.experimental.pallas import tpu as pltpu

LANE = 128     # pad the output (action) axis to a multiple of this -> lane-dense stores
SUBLANE = 8    # batch tiles must be a multiple of the sublane count


def _round_up(v, m):
    return (v + m - 1) // m * m


def critic_kernel(x_ref, w1_ref, b1_ref, w2_ref, b2_ref, q_ref, *, mxu_bf16):
    x = x_ref[...]                       # (TB, S)
    w1 = w1_ref[...]                     # (S, H)   VMEM-resident across grid steps
    w2 = w2_ref[...]                     # (H, Apad)
    if mxu_bf16:                         # v6e/v7x: bf16 MXU operands, f32 accumulate
        x = x.astype(jnp.bfloat16)
        w1 = w1.astype(jnp.bfloat16)
    # Hidden layer: Linear + ReLU (MXU matmul, f32 accumulate; bias broadcast on VPU)
    h = jnp.dot(x, w1, preferred_element_type=jnp.float32) + b1_ref[...]
    h = jnp.maximum(h, 0.0)
    if mxu_bf16:
        h = h.astype(jnp.bfloat16)
        w2 = w2.astype(jnp.bfloat16)
    # Output layer: Linear (output axis padded to a full 128-lane slab)
    q = jnp.dot(h, w2, preferred_element_type=jnp.float32) + b2_ref[...]
    q_ref[...] = q.astype(q_ref.dtype)   # unmasked, lane-dense store


def critic_forward(x, w1, b1, w2, b2, *, tile_b=512, mxu_bf16=False):
    """x:(B,S), w1:(S,H), b1:(1,H), w2:(H,A), b2:(1,A) -> q:(B,A)."""
    B, S = x.shape
    H, A = w2.shape
    assert w1.shape == (S, H)

    A_pad = _round_up(A, LANE)                      # lane-dense output width
    TB = min(tile_b, _round_up(B, SUBLANE))         # batch tile (multiple of 8)
    B_pad = _round_up(B, TB)

    xp = jnp.pad(x, ((0, B_pad - B), (0, 0))) if B_pad != B else x
    w2p = jnp.pad(w2, ((0, 0), (0, A_pad - A))) if A_pad != A else w2
    b2p = jnp.pad(b2, ((0, 0), (0, A_pad - A))) if A_pad != A else b2
    b1v = b1.reshape(1, H)
    b2v = b2p.reshape(1, A_pad)

    grid = (B_pad // TB,)
    flops = 2 * B_pad * (S * H + H * A_pad)
    bytes_accessed = 4 * (xp.size + w1.size + b1v.size + w2p.size + b2v.size
                          + B_pad * A_pad)

    qp = pl.pallas_call(
        functools.partial(critic_kernel, mxu_bf16=mxu_bf16),
        out_shape=jax.ShapeDtypeStruct((B_pad, A_pad), jnp.float32),
        grid=grid,
        in_specs=[
            pl.BlockSpec((TB, S), lambda i: (i, 0)),      # x: tiled over batch
            pl.BlockSpec((S, H), lambda i: (0, 0)),       # w1: resident, no per-step DMA
            pl.BlockSpec((1, H), lambda i: (0, 0)),       # b1: resident
            pl.BlockSpec((H, A_pad), lambda i: (0, 0)),   # w2: resident
            pl.BlockSpec((1, A_pad), lambda i: (0, 0)),   # b2: resident
        ],
        out_specs=pl.BlockSpec((TB, A_pad), lambda i: (i, 0)),
        compiler_params=pltpu.CompilerParams(
            dimension_semantics=("parallel",),            # v7x: shard batch over 2 TCs
        ),
        cost_estimate=pl.CostEstimate(
            flops=flops, transcendentals=0, bytes_accessed=bytes_accessed),
    )(xp, w1, b1v, w2p, b2v)

    return qp[:B, :A]


def init_critic_params(key, state_dim, action_dim, hidden):
    # Deterministic init mimicking PyTorch Linear default (uniform +/- 1/sqrt(fan_in)).
    k1, k2, k3, k4 = jax.random.split(key, 4)
    lim1 = 1.0 / jnp.sqrt(state_dim)
    lim2 = 1.0 / jnp.sqrt(hidden)
    w1 = jax.random.uniform(k1, (state_dim, hidden), jnp.float32, -lim1, lim1)
    b1 = jax.random.uniform(k2, (1, hidden), jnp.float32, -lim1, lim1)
    w2 = jax.random.uniform(k3, (hidden, action_dim), jnp.float32, -lim2, lim2)
    b2 = jax.random.uniform(k4, (1, action_dim), jnp.float32, -lim2, lim2)
    return w1, b1, w2, b2


def _reference(x, w1, b1, w2, b2):
    h = jnp.maximum(x @ w1 + b1, 0.0)
    return h @ w2 + b2


if __name__ == "__main__":
    # Small shapes consistent with the module: batch=8, state_dim=16,
    # hidden_sizes=[128], action_dim=8.
    B, S, H, A = 8, 16, 128, 8

    key = jax.random.PRNGKey(0)
    kx, kp, kx2 = jax.random.split(key, 3)
    x = jax.random.normal(kx, (B, S), jnp.float32)
    w1, b1, w2, b2 = init_critic_params(kp, S, A, H)

    q = critic_forward(x, w1, b1, w2, b2)
    jax.block_until_ready(q)
    assert q.shape == (B, A)
    assert jnp.allclose(q, _reference(x, w1, b1, w2, b2), atol=1e-5), "q mismatch"

    # Also exercise a batch that is not a multiple of the sublane count
    # (padding + slice path).
    B2 = 10
    x2 = jax.random.normal(kx2, (B2, S), jnp.float32)
    q2 = critic_forward(x2, w1, b1, w2, b2)
    jax.block_until_ready(q2)
    assert q2.shape == (B2, A)
    assert jnp.allclose(q2, _reference(x2, w1, b1, w2, b2), atol=1e-5), "q2 mismatch"

    print("KERNEL_OK")
</pallas_src>

<mosaic_0001>
module attributes {stable_mosaic.version = 11 : i64} {
  func.func @critic_kernel(%arg0: i32, %arg1: memref<8x16xf32, #tpu.memory_space<vmem>>, %arg2: memref<16x128xf32, #tpu.memory_space<vmem>>, %arg3: memref<1x128xf32, #tpu.memory_space<vmem>>, %arg4: memref<128x128xf32, #tpu.memory_space<vmem>>, %arg5: memref<1x128xf32, #tpu.memory_space<vmem>>, %arg6: memref<8x128xf32, #tpu.memory_space<vmem>>) attributes {dimension_semantics = [#tpu.dimension_semantics<parallel>], iteration_bounds = array<i64: 1>, scalar_prefetch = 0 : i64, scratch_operands = 0 : i64, tpu.core_type = #tpu.core_type<tc>, window_params = [{transform_indices = @transform_0, window_bounds = array<i64: 8, 16>}, {pipeline_mode = #tpu.pipeline_mode<synchronous>, transform_indices = @transform_1, window_bounds = array<i64: 16, 128>}, {pipeline_mode = #tpu.pipeline_mode<synchronous>, transform_indices = @transform_2, window_bounds = array<i64: 1, 128>}, {pipeline_mode = #tpu.pipeline_mode<synchronous>, transform_indices = @transform_3, window_bounds = array<i64: 128, 128>}, {pipeline_mode = #tpu.pipeline_mode<synchronous>, transform_indices = @transform_4, window_bounds = array<i64: 1, 128>}, {transform_indices = @transform_5, window_bounds = array<i64: 8, 128>}]} {
    %c0 = arith.constant 0 : index
    %c0_0 = arith.constant 0 : index
    %0 = vector.load %arg1[%c0, %c0_0] : memref<8x16xf32, #tpu.memory_space<vmem>>, vector<8x16xf32>
    %c0_1 = arith.constant 0 : index
    %c0_2 = arith.constant 0 : index
    %1 = vector.load %arg2[%c0_1, %c0_2] : memref<16x128xf32, #tpu.memory_space<vmem>>, vector<16x128xf32>
    %c0_3 = arith.constant 0 : index
    %c0_4 = arith.constant 0 : index
    %2 = vector.load %arg4[%c0_3, %c0_4] : memref<128x128xf32, #tpu.memory_space<vmem>>, vector<128x128xf32>
    %cst = arith.constant dense<0.000000e+00> : vector<8x128xf32>
    %3 = tpu.matmul %0, %1, %cst {dimension_numbers = #tpu.dot_dimension_numbers<[1], [0], [0], [1], [0, 0, 1, 1], [], []>} : vector<8x16xf32>, vector<16x128xf32>, vector<8x128xf32> -> vector<8x128xf32>
    %c0_5 = arith.constant 0 : index
    %c0_6 = arith.constant 0 : index
    %4 = vector.load %arg3[%c0_5, %c0_6] : memref<1x128xf32, #tpu.memory_space<vmem>>, vector<1x128xf32>
    %5 = vector.broadcast %4 : vector<1x128xf32> to vector<8x128xf32>
    %6 = arith.addf %3, %5 : vector<8x128xf32>
    %cst_7 = arith.constant 0.000000e+00 : f32
    %7 = vector.broadcast %cst_7 : f32 to vector<8x128xf32>
    %8 = arith.maximumf %6, %7 : vector<8x128xf32>
    %cst_8 = arith.constant dense<0.000000e+00> : vector<8x128xf32>
    %9 = tpu.matmul %8, %2, %cst_8 {dimension_numbers = #tpu.dot_dimension_numbers<[1], [0], [0], [1], [0, 0, 1, 1], [], []>} : vector<8x128xf32>, vector<128x128xf32>, vector<8x128xf32> -> vector<8x128xf32>
    %c0_9 = arith.constant 0 : index
    %c0_10 = arith.constant 0 : index
    %10 = vector.load %arg5[%c0_9, %c0_10] : memref<1x128xf32, #tpu.memory_space<vmem>>, vector<1x128xf32>
    %11 = vector.broadcast %10 : vector<1x128xf32> to vector<8x128xf32>
    %12 = arith.addf %9, %11 : vector<8x128xf32>
    %c0_11 = arith.constant 0 : index
    %c0_12 = arith.constant 0 : index
    %13 = vector.load %arg6[%c0_11, %c0_12] : memref<8x128xf32, #tpu.memory_space<vmem>>, vector<8x128xf32>
    tpu.vector_store %arg6[%c0_11, %c0_12], %12 {strides = array<i32>} : memref<8x128xf32, #tpu.memory_space<vmem>>, vector<8x128xf32>,
    return
  }
  func.func @transform_0(%arg0: i32) -> (i32, i32) {
    %c0_i32 = arith.constant 0 : i32
    %c0_i32_0 = arith.constant 0 : i32
    return %arg0, %c0_i32 : i32, i32
  }
  func.func @transform_1(%arg0: i32) -> (i32, i32) {
    %c0_i32 = arith.constant 0 : i32
    %c0_i32_0 = arith.constant 0 : i32
    %c0_i32_1 = arith.constant 0 : i32
    return %c0_i32, %c0_i32_0 : i32, i32
  }
  func.func @transform_2(%arg0: i32) -> (i32, i32) {
    %c0_i32 = arith.constant 0 : i32
    %c0_i32_0 = arith.constant 0 : i32
    %c0_i32_1 = arith.constant 0 : i32
    return %c0_i32, %c0_i32_0 : i32, i32
  }
  func.func @transform_3(%arg0: i32) -> (i32, i32) {
    %c0_i32 = arith.constant 0 : i32
    %c0_i32_0 = arith.constant 0 : i32
    %c0_i32_1 = arith.constant 0 : i32
    return %c0_i32, %c0_i32_0 : i32, i32
  }
  func.func @transform_4(%arg0: i32) -> (i32, i32) {
    %c0_i32 = arith.constant 0 : i32
    %c0_i32_0 = arith.constant 0 : i32
    %c0_i32_1 = arith.constant 0 : i32
    return %c0_i32, %c0_i32_0 : i32, i32
  }
  func.func @transform_5(%arg0: i32) -> (i32, i32) {
    %c0_i32 = arith.constant 0 : i32
    %c0_i32_0 = arith.constant 0 : i32
    return %arg0, %c0_i32 : i32, i32
  }
}

</mosaic_0001>

<bundles_post_ra>
// kernel: tpu_custom_call.1
= control target key start
LH: loop header
LB: loop body
LE: loop exit
PB: predicated region body
PF: predicated region fallthrough
CT: control target
= control target key end

     0   :  { %10 = vsyncpa [#allocation3], 0  ;;  %s549_s0 = inlined_call_operand.hbm [shape: f32[8,16], index: 0, kind: input, shape index: {}]   ;;  %s550_s1 = inlined_call_operand.hbm [shape: f32[16,128], index: 1, kind: input, shape index: {}]   ;;  %s551_s2 = inlined_call_operand.vmem [shape: f32[1,128], index: 2, kind: input, shape index: {}]   ;;  %s552_s3 = inlined_call_operand.hbm [shape: f32[128,128], index: 3, kind: input, shape index: {}]   ;;  %s553_s4 = inlined_call_operand.vmem [shape: f32[1,128], index: 4, kind: input, shape index: {}]   ;;  %s554_s5 = inlined_call_operand.hbm [shape: f32[8,128], index: 5, kind: output, shape index: {}]  }
   0x1   :  { %11 = vsyncpa [#allocation6], 0 }
   0x2   :  { %12 = vsyncpa [#allocation4], 0  ;;  %s450_s18 = smov [#allocation5]   ;;  %s356_s22 = scalar_lea.hbm %s550_s1, 256 }
   0x3   :  { %s28_s19 = sshll.u32 %s450_s18, 4  ;;  %p357_p0 = scmp.ne.s32.totalorder %s550_s1, %s356_s22  ;;  %s29_s19 = int_to_ptr.vmem [resolvable:$true] %s28_s19 }
   0x4   :  { %p360_p1 = scmp.lt.u32.totalorder %s356_s22, %s550_s1 }
   0x6   :  { %p362_p2 = pnand %p360_p1, %p357_p0 }
   0x8   :  { %365 = shalt.err (!%p362_p2)
}
   0x9   :  { %s366_s27 = scalar_lea.vmem %s29_s19, 256  ;;  %p371_p4 = scmp.lt.s32.totalorder %s29_s19, %s29_s19 }
   0xa   :  { %p367_p3 = scmp.ne.s32.totalorder %s29_s19, %s366_s27  ;;  %p372_p5 = scmp.lt.s32.totalorder %s366_s27, %s366_s27 }
   0xc   :  { %p373_p6 = por %p372_p5, %p371_p4 }
   0xe   :  { %p374_p7 = pnand %p373_p6, %p367_p3 }
  0x10   :  { %377 = shalt.err (!%p374_p7)
}
  0x11   :  { %s451_s28 = smov 128   ;;  %s452_s29 = smov 8  }
  0x12   :  { %34 = dma.hbm_to_vmem [thread:$0]  %s550_s1, 256, %s29_s19, [#allocation6], %s451_s28, %s451_s28, %s452_s29  }
  0x13   :  { %s453_s7 = smov [#allocation2]   ;;  %s454_s9 = smov [#allocation7]  }
  0x14   :  { %s19_s8 = sshll.u32 %s453_s7, 4  ;;  %s42_s10 = sshll.u32 %s454_s9, 4  ;;  %s20_s8 = int_to_ptr.vmem [resolvable:$true] %s19_s8  ;;  %s43_s10 = int_to_ptr.vmem [resolvable:$true] %s42_s10 }
  0x15   :  { %s378_s13 = scalar_lea.hbm %s549_s0, 128 }
  0x16   :  { %p379_p8 = scmp.ne.s32.totalorder %s549_s0, %s378_s13  ;;  %p382_p9 = scmp.lt.u32.totalorder %s378_s13, %s549_s0 }
  0x18   :  { %p384_p10 = pnand %p382_p9, %p379_p8 }
  0x1a   :  { %387 = shalt.err (!%p384_p10)
}
  0x1b   :  { %s388_s1 = scalar_lea.vmem %s20_s8, 128  ;;  %p393_p12 = scmp.lt.s32.totalorder %s20_s8, %s20_s8 }
  0x1c   :  { %p389_p11 = scmp.ne.s32.totalorder %s20_s8, %s388_s1  ;;  %p394_p13 = scmp.lt.s32.totalorder %s388_s1, %s388_s1 }
  0x1e   :  { %p395_p0 = por %p394_p13, %p393_p12 }
  0x20   :  { %p396_p1 = pnand %p395_p0, %p389_p11 }
  0x22   :  { %399 = shalt.err (!%p396_p1)
}
  0x23   :  { %22 = dma.hbm_to_vmem [thread:$0]  %s549_s0, 128, %s20_s8, [#allocation3]  }
  0x24   :  { %s400_s22 = scalar_lea.hbm %s552_s3, 2048 }
  0x25   :  { %p401_p2 = scmp.ne.s32.totalorder %s552_s3, %s400_s22  ;;  %p404_p3 = scmp.lt.u32.totalorder %s400_s22, %s552_s3 }
  0x27   :  { %p406_p4 = pnand %p404_p3, %p401_p2 }
  0x29   :  { %409 = shalt.err (!%p406_p4)
}
  0x2a   :  { %s410_s27 = scalar_lea.vmem %s43_s10, 2048  ;;  %p415_p6 = scmp.lt.s32.totalorder %s43_s10, %s43_s10 }
  0x2b   :  { %p411_p5 = scmp.ne.s32.totalorder %s43_s10, %s410_s27  ;;  %p416_p7 = scmp.lt.s32.totalorder %s410_s27, %s410_s27 }
  0x2d   :  { %p417_p8 = por %p416_p7, %p415_p6 }
  0x2f   :  { %p418_p9 = pnand %p417_p8, %p411_p5 }
  0x31   :  { %421 = shalt.err (!%p418_p9)
}
  0x32   :  { %48 = dma.hbm_to_vmem [thread:$0]  %s552_s3, 2048, %s43_s10, [#allocation6], %s451_s28, %s451_s28, %s452_s29  }
  0x33   :  { %444 = dma.done.wait [#allocation3], 128  }
  0x34   :  { %445 = vsyncadd [#allocation3], 4294967168 }
  0x35   :  { %446 = dma.done.wait [#allocation6], 2304  }
  0x36   :  { %447 = vsyncadd [#allocation6], 4294964992  ;;  %v455_v0 = vmov 0.0|0.0   ;;  %vm456_vm0 = vmmov 0   ;;  %v457_v1 = vmov 0.0   ;;  %v61_v2 = vld [vmem:[#allocation5] sm:$0xff] }
  0x37   :  { %320 = vmatprep.subr.bf16.mxu0 %v455_v0  ;;  %282 = vmatprep.mubr.msk.f32.mxu0 %vm456_vm0, %v457_v1  ;;  %v62_v3 = vld [vmem:[#allocation5 + $0x8] sm:$0xff]  ;;  %v63_v5 = vld [vmem:[#allocation7] sm:$0xff]  ;;  %v64_v6 = vld [vmem:[#allocation7 + $0x8] sm:$0xff]  ;;  %vm86_vm1 = vcmask 130048   ;;  %s458_s7 = smov [#allocation8]  }
  0x38   :  { %323 = vmatprep.subr.bf16.mxu1 %v455_v0  ;;  %317 = vmatprep.mubr.msk.f32.mxu1 %vm456_vm0, %v457_v1  ;;  %v321_v4 = vpack.c.bf16 %v62_v3, %v61_v2  ;;  %v65_v7 = vld [vmem:[#allocation7 + $0x10] sm:$0xff]  ;;  %v324_v8 = vpack.c.bf16 %v64_v6, %v63_v5  ;;  %v66_v9 = vld [vmem:[#allocation7 + $0x18] sm:$0xff]  ;;  %v60_v10 = vld [vmem:[#allocation2] sm:$0xff]  ;;  %s245_s8 = sshll.u32 %s458_s7, 4  ;;  %s246_s8 = int_to_ptr.vmem [resolvable:$true] %s245_s8 }
  0x39   :  { %v327_v11 = vpack.c.bf16 %v66_v9, %v65_v7  ;;  %v67_v12 = vld [vmem:[#allocation7 + $0x20] sm:$0xff]  ;;  %v68_v13 = vld [vmem:[#allocation7 + $0x28] sm:$0xff]  ;;  %v69_v15 = vld [vmem:[#allocation7 + $0x30] sm:$0xff]  ;;  %s422_s9 = scalar_lea.vmem %s246_s8, 128  ;;  %p427_p11 = scmp.lt.s32.totalorder %s246_s8, %s246_s8 }
  0x3a   :  { %322 = vmatpush3.bf16.msra.mxu0 %v321_v4  ;;  %325 = vmatpush3.bf16.msra.mxu1 %v324_v8  ;;  %v330_v14 = vpack.c.bf16 %v68_v13, %v67_v12  ;;  %v70_v16 = vld [vmem:[#allocation7 + $0x38] sm:$0xff]  ;;  %v71_v18 = vld [vmem:[#allocation7 + $0x40] sm:$0xff]  ;;  %v72_v19 = vld [vmem:[#allocation7 + $0x48] sm:$0xff]  ;;  %p423_p10 = scmp.ne.s32.totalorder %s246_s8, %s422_s9  ;;  %p428_p12 = scmp.lt.s32.totalorder %s422_s9, %s422_s9 }
  0x3b   :  { %326 = vmatprep.subr.bf16.mxu1 %v455_v0  ;;  %v333_v17 = vpack.c.bf16 %v70_v16, %v69_v15  ;;  %v336_v20 = vpack.c.bf16 %v72_v19, %v71_v18  ;;  %v73_v21 = vld [vmem:[#allocation7 + $0x50] sm:$0xff]  ;;  %v74_v22 = vld [vmem:[#allocation7 + $0x58] sm:$0xff]  ;;  %v75_v24 = vld [vmem:[#allocation7 + $0x60] sm:$0xff] }
  0x3c   :  { %v339_v23 = vpack.c.bf16 %v74_v22, %v73_v21  ;;  %v76_v25 = vld [vmem:[#allocation7 + $0x68] sm:$0xff]  ;;  %v77_v27 = vld [vmem:[#allocation7 + $0x70] sm:$0xff]  ;;  %v78_v28 = vld [vmem:[#allocation7 + $0x78] sm:$0xff]  ;;  %p429_p13 = por %p428_p12, %p427_p11 }
  0x3d   :  { %283 = vmatmul.mubr.msk.f32.vlgmr.msra.gmra.mrb[0].mxu0 %vm86_vm1, %v60_v10  ;;  %v342_v26 = vpack.c.bf16 %v76_v25, %v75_v24  ;;  %v345_v29 = vpack.c.bf16 %v78_v28, %v77_v27  ;;  %v255_v30 = vld [vmem:[%s551_s2] ss:$0 sm:$0xff] }
  0x3e   :  { %328 = vmatpush3.bf16.msra.mxu1 %v327_v11  ;;  %v257_v35 = vld [vmem:[%s553_s4] ss:$0 sm:$0xff]  ;;  %p430_p0 = pnand %p429_p13, %p423_p10 }
  0x3f   :  { %329 = vmatprep.subr.bf16.mxu1 %v455_v0 }
  0x42   :  { %331 = vmatpush3.bf16.msra.mxu1 %v330_v14 }
  0x43   :  { %332 = vmatprep.subr.bf16.mxu1 %v455_v0 }
  0x46   :  { %334 = vmatpush3.bf16.msra.mxu1 %v333_v17 }
  0x47   :  { %335 = vmatprep.subr.bf16.mxu1 %v455_v0 }
  0x4a   :  { %337 = vmatpush3.bf16.msra.mxu1 %v336_v20 }
  0x4b   :  { %338 = vmatprep.subr.bf16.mxu1 %v455_v0 }
  0x4e   :  { %340 = vmatpush3.bf16.msra.mxu1 %v339_v23 }
  0x4f   :  { %341 = vmatprep.subr.bf16.mxu1 %v455_v0 }
  0x52   :  { %343 = vmatpush3.bf16.msra.mxu1 %v342_v26 }
  0x53   :  { %344 = vmatprep.subr.bf16.mxu1 %v455_v0 }
  0x56   :  { %346 = vmatpush3.bf16.msra.mxu1 %v345_v29 }
 0x110   :  { %v156_v31 = vpop.f32.mrb[0].mxu0 }
 0x111   :  { %v157_v32 = vadd.f32 %v255_v30, %v156_v31  ;;  %v284_v33 = vpop.f32.mrb[1].mxu0 }
 0x113   :  { %v160_v34 = vmax.f32 %v157_v32, 0.0 }
 0x115   :  { %318 = vmatmul.mubr.f32.vlgmr.msra.gmra.mrb[0].mxu1 %v160_v34 }
 0x1e8   :  { %v234_v36 = vpop.f32.mrb[0].mxu1 }
 0x1e9   :  { %v235_v37 = vadd.f32 %v257_v35, %v234_v36  ;;  %v319_v38 = vpop.f32.mrb[1].mxu1 }
 0x1eb   :  { %238 = vst [vmem:[#allocation8] sm:$0xff] %v235_v37 }
 0x1ec   :  { %433 = shalt.err (!%p430_p0)
}
 0x1ed   :  { %s434_s11 = scalar_lea.hbm %s554_s5, 128 }
 0x1ee   :  { %p435_p1 = scmp.ne.s32.totalorder %s554_s5, %s434_s11  ;;  %p438_p2 = scmp.lt.u32.totalorder %s434_s11, %s554_s5 }
 0x1f0   :  { %p440_p3 = pnand %p438_p2, %p435_p1 }
 0x1f2   :  { %443 = shalt.err (!%p440_p3)
}
 0x1f3   :  { %248 = dma.vmem_to_hbm [thread:$0]  %s246_s8, 128, %s554_s5, [#allocation4]  }
 0x1f4   :  { %448 = dma.done.wait [#allocation4], 128  }
 0x1f5   :  { %449 = vsyncadd [#allocation4], 4294967168 }
 0x1f6   :  { %252 = vsyncpa [#allocation3], 1 }
 0x1f7   :  { %253 = vsyncpa [#allocation6], 1 }
 0x1f8   :  { %254 = vsyncpa [#allocation4], 1 }

</bundles_post_ra>
